<compile_context>
chip_gen: v5e
topology: v5e:2x2
jax: 0.10.0
libtpu: 0.0.40
codegen_flags: <defaults>
</compile_context>

<pallas_src>
import jax
import jax.numpy as jnp
from jax.experimental import pallas as pl
from jax.experimental.pallas import tpu as pltpu

# ----- "config" values (small, synthetic) -----
LATENT_DIM = 32        # config.latent_space_dim
LAYER_DEPTH = 128      # layerDepth (kept small + lane-aligned)
IMAGE_SIZE = 16        # config.IMAGE_SIZE
N_CHANNELS = 4         # config.N_channels
OUT_DIM = N_CHANNELS * IMAGE_SIZE * IMAGE_SIZE  # 1024

MAX_BATCH_TILE = 1024  # (TB,1024) bf16 out double-buffer + f32 intermediates ~11 MiB
SUBLANE_ALIGN = 16     # bf16 packs 16 sublanes per vreg -> unmasked, lane-dense tiles


def _round_up(x, m):
    return ((x + m - 1) // m) * m


def _cdiv(a, b):
    return -(-a // b)


def decoder_fc_kernel(x_ref, w1_ref, b1_ref, w2_ref, b2_ref, w3_ref, b3_ref, o_ref):
    """Fused MLP hot path: 3 bf16 MXU matmuls (f32 accumulate) + VPU/EUP elementwise."""
    x = x_ref[...]                                                      # (TB, latent) bf16

    # Block 1: Linear + LeakyReLU(0.2)
    h1 = jnp.dot(x, w1_ref[...], preferred_element_type=jnp.float32) + b1_ref[...]
    h1 = jnp.maximum(h1, 0.2 * h1)

    # Block 2: Linear + LeakyReLU(0.2)
    h2 = jnp.dot(h1.astype(jnp.bfloat16), w2_ref[...],
                 preferred_element_type=jnp.float32) + b2_ref[...]
    h2 = jnp.maximum(h2, 0.2 * h2)

    # Final Linear + Sigmoid.  sigmoid(x) == 0.5*tanh(0.5*x) + 0.5: a single EUP
    # transcendental per element, no reciprocal/divide.
    h3 = jnp.dot(h2.astype(jnp.bfloat16), w3_ref[...],
                 preferred_element_type=jnp.float32) + b3_ref[...]
    o_ref[...] = (0.5 * jnp.tanh(0.5 * h3) + 0.5).astype(o_ref.dtype)


@jax.jit
def decoder_fc_forward(x, params):
    """x: (B, latent) float32 (already flat; nn.Flatten is an identity here).

    Returns (B, C, S, S) in bfloat16 (sigmoid activations).
    """
    w1, b1, w2, b2, w3, b3 = params
    B = x.shape[0]

    # bf16 inputs/weights: halves HBM->VMEM traffic, native MXU bf16 path on all
    # three generations.  Biases stay f32 (added to the f32 accumulator).
    x = x.astype(jnp.bfloat16)
    w1 = w1.astype(jnp.bfloat16)
    w2 = w2.astype(jnp.bfloat16)
    w3 = w3.astype(jnp.bfloat16)

    # Tiling: choose n_tiles first (bounds padding waste to <16 rows per tile),
    # force >=2 tiles for non-tiny batches so v7x's two TensorCores both run,
    # then align the tile to 16 sublanes for bf16 packing.
    b_min = _round_up(B, SUBLANE_ALIGN)
    n_tiles = _cdiv(b_min, MAX_BATCH_TILE)
    if b_min >= 2 * SUBLANE_ALIGN:
        n_tiles = max(n_tiles, 2)
    tb = _round_up(_cdiv(b_min, n_tiles), SUBLANE_ALIGN)
    b_pad = tb * n_tiles
    if b_pad != B:
        x = jnp.pad(x, ((0, b_pad - B), (0, 0)))

    # Advisory cost hint for the XLA scheduler.
    flops = 2 * b_pad * (LATENT_DIM * LAYER_DEPTH
                         + LAYER_DEPTH * LAYER_DEPTH
                         + LAYER_DEPTH * OUT_DIM)
    bytes_accessed = (
        b_pad * LATENT_DIM * 2                            # x (bf16)
        + (w1.size + w2.size + w3.size) * 2               # weights (bf16)
        + (b1.size + b2.size + b3.size) * 4               # biases (f32)
        + b_pad * OUT_DIM * 2                             # out (bf16)
    )
    cost = pl.CostEstimate(flops=flops,
                           transcendentals=b_pad * OUT_DIM,
                           bytes_accessed=bytes_accessed)

    # x / out are tiled over the batch grid; weight & bias blocks use constant
    # index maps so their (full-array) blocks stay VMEM-resident across steps.
    const = lambda i: (0, 0)
    flat = pl.pallas_call(
        decoder_fc_kernel,
        out_shape=jax.ShapeDtypeStruct((b_pad, OUT_DIM), jnp.bfloat16),
        grid_spec=pltpu.PrefetchScalarGridSpec(
            num_scalar_prefetch=0,
            grid=(n_tiles,),
            in_specs=[
                pl.BlockSpec((tb, LATENT_DIM), lambda i: (i, 0)),       # x
                pl.BlockSpec((LATENT_DIM, LAYER_DEPTH), const),         # w1
                pl.BlockSpec((1, LAYER_DEPTH), const),                  # b1
                pl.BlockSpec((LAYER_DEPTH, LAYER_DEPTH), const),        # w2
                pl.BlockSpec((1, LAYER_DEPTH), const),                  # b2
                pl.BlockSpec((LAYER_DEPTH, OUT_DIM), const),            # w3
                pl.BlockSpec((1, OUT_DIM), const),                      # b3
            ],
            out_specs=pl.BlockSpec((tb, OUT_DIM), lambda i: (i, 0)),
        ),
        compiler_params=pltpu.CompilerParams(
            dimension_semantics=("parallel",),            # v7x: shard steps across 2 TCs
            vmem_limit_bytes=48 * 1024 * 1024,            # TB=1024 safe on v5e's small
                                                          # default; < v7x 64 MiB physical
        ),
        cost_estimate=cost,
    )(x, w1, b1, w2, b2, w3, b3)

    # Drop batch padding, then nn.Unflatten(1, (C, S, S)) -> NCHW.
    if b_pad != B:
        flat = flat[:B]
    return flat.reshape(B, N_CHANNELS, IMAGE_SIZE, IMAGE_SIZE)


def init_params(key):
    """Deterministic init mimicking torch.nn.Linear default (U[-1/sqrt(fan_in), +])."""
    ks = jax.random.split(key, 6)

    def linear(kw, kb, fan_in, fan_out):
        bound = 1.0 / jnp.sqrt(fan_in)
        # stored as (in, out) so the kernel does x @ W (== torch's x @ W.T)
        w = jax.random.uniform(kw, (fan_in, fan_out), jnp.float32, -bound, bound)
        b = jax.random.uniform(kb, (1, fan_out), jnp.float32, -bound, bound)
        return w, b

    w1, b1 = linear(ks[0], ks[1], LATENT_DIM, LAYER_DEPTH)
    w2, b2 = linear(ks[2], ks[3], LAYER_DEPTH, LAYER_DEPTH)
    w3, b3 = linear(ks[4], ks[5], LAYER_DEPTH, OUT_DIM)
    return (w1, b1, w2, b2, w3, b3)


def reference_forward(x, params):
    """Pure-JAX reference mirroring the kernel's bf16-weight / f32-accumulate math."""
    w1, b1, w2, b2, w3, b3 = params
    bf = jnp.bfloat16

    h = jnp.dot(x.astype(bf), w1.astype(bf), preferred_element_type=jnp.float32) + b1
    h = jnp.maximum(h, 0.2 * h)
    h = jnp.dot(h.astype(bf), w2.astype(bf), preferred_element_type=jnp.float32) + b2
    h = jnp.maximum(h, 0.2 * h)
    h = jax.nn.sigmoid(
        jnp.dot(h.astype(bf), w3.astype(bf), preferred_element_type=jnp.float32) + b3)
    return h.reshape(x.shape[0], N_CHANNELS, IMAGE_SIZE, IMAGE_SIZE)


if __name__ == "__main__":
    key = jax.random.PRNGKey(0)
    k_x, k_p = jax.random.split(key)

    B = 2
    x = jax.random.normal(k_x, (B, LATENT_DIM), jnp.float32)  # latent code input
    params = init_params(k_p)

    out = decoder_fc_forward(x, params)
    out = jax.block_until_ready(out)

    assert out.shape == (B, N_CHANNELS, IMAGE_SIZE, IMAGE_SIZE), out.shape
    assert out.dtype == jnp.bfloat16, out.dtype

    ref = reference_forward(x, params)
    out_f32 = out.astype(jnp.float32)
    assert jnp.allclose(out_f32, ref, atol=2e-2, rtol=2e-2), "mismatch vs JAX reference"
    assert bool(jnp.all(jnp.isfinite(out_f32)))

    print("KERNEL_OK")
</pallas_src>

<mosaic_0001>
module attributes {stable_mosaic.version = 11 : i64} {
  func.func @decoder_fc_kernel(%arg0: i32, %arg1: memref<16x32xbf16, #tpu.memory_space<vmem>>, %arg2: memref<32x128xbf16, #tpu.memory_space<vmem>>, %arg3: memref<1x128xf32, #tpu.memory_space<vmem>>, %arg4: memref<128x128xbf16, #tpu.memory_space<vmem>>, %arg5: memref<1x128xf32, #tpu.memory_space<vmem>>, %arg6: memref<128x1024xbf16, #tpu.memory_space<vmem>>, %arg7: memref<1x1024xf32, #tpu.memory_space<vmem>>, %arg8: memref<16x1024xbf16, #tpu.memory_space<vmem>>) attributes {dimension_semantics = [#tpu.dimension_semantics<parallel>], iteration_bounds = array<i64: 1>, scalar_prefetch = 0 : i64, scratch_operands = 0 : i64, tpu.core_type = #tpu.core_type<tc>, window_params = [{transform_indices = @transform_0, window_bounds = array<i64: 16, 32>}, {pipeline_mode = #tpu.pipeline_mode<synchronous>, transform_indices = @transform_1, window_bounds = array<i64: 32, 128>}, {pipeline_mode = #tpu.pipeline_mode<synchronous>, transform_indices = @transform_2, window_bounds = array<i64: 1, 128>}, {pipeline_mode = #tpu.pipeline_mode<synchronous>, transform_indices = @transform_3, window_bounds = array<i64: 128, 128>}, {pipeline_mode = #tpu.pipeline_mode<synchronous>, transform_indices = @transform_4, window_bounds = array<i64: 1, 128>}, {pipeline_mode = #tpu.pipeline_mode<synchronous>, transform_indices = @transform_5, window_bounds = array<i64: 128, 1024>}, {pipeline_mode = #tpu.pipeline_mode<synchronous>, transform_indices = @transform_6, window_bounds = array<i64: 1, 1024>}, {transform_indices = @transform_7, window_bounds = array<i64: 16, 1024>}]} {
    %c0 = arith.constant 0 : index
    %c0_0 = arith.constant 0 : index
    %0 = vector.load %arg1[%c0, %c0_0] : memref<16x32xbf16, #tpu.memory_space<vmem>>, vector<16x32xbf16>
    %c0_1 = arith.constant 0 : index
    %c0_2 = arith.constant 0 : index
    %1 = vector.load %arg2[%c0_1, %c0_2] : memref<32x128xbf16, #tpu.memory_space<vmem>>, vector<32x128xbf16>
    %cst = arith.constant dense<0.000000e+00> : vector<16x128xf32>
    %2 = tpu.matmul %0, %1, %cst {dimension_numbers = #tpu.dot_dimension_numbers<[1], [0], [0], [1], [0, 0, 1, 1], [], []>} : vector<16x32xbf16>, vector<32x128xbf16>, vector<16x128xf32> -> vector<16x128xf32>
    %c0_3 = arith.constant 0 : index
    %c0_4 = arith.constant 0 : index
    %3 = vector.load %arg3[%c0_3, %c0_4] : memref<1x128xf32, #tpu.memory_space<vmem>>, vector<1x128xf32>
    %4 = vector.broadcast %3 : vector<1x128xf32> to vector<16x128xf32>
    %5 = arith.addf %2, %4 : vector<16x128xf32>
    %cst_5 = arith.constant 2.000000e-01 : f32
    %6 = vector.broadcast %cst_5 : f32 to vector<16x128xf32>
    %7 = arith.mulf %6, %5 : vector<16x128xf32>
    %8 = arith.maximumf %5, %7 : vector<16x128xf32>
    %9 = arith.truncf %8 : vector<16x128xf32> to vector<16x128xbf16>
    %c0_6 = arith.constant 0 : index
    %c0_7 = arith.constant 0 : index
    %10 = vector.load %arg4[%c0_6, %c0_7] : memref<128x128xbf16, #tpu.memory_space<vmem>>, vector<128x128xbf16>
    %cst_8 = arith.constant dense<0.000000e+00> : vector<16x128xf32>
    %11 = tpu.matmul %9, %10, %cst_8 {dimension_numbers = #tpu.dot_dimension_numbers<[1], [0], [0], [1], [0, 0, 1, 1], [], []>} : vector<16x128xbf16>, vector<128x128xbf16>, vector<16x128xf32> -> vector<16x128xf32>
    %c0_9 = arith.constant 0 : index
    %c0_10 = arith.constant 0 : index
    %12 = vector.load %arg5[%c0_9, %c0_10] : memref<1x128xf32, #tpu.memory_space<vmem>>, vector<1x128xf32>
    %13 = vector.broadcast %12 : vector<1x128xf32> to vector<16x128xf32>
    %14 = arith.addf %11, %13 : vector<16x128xf32>
    %cst_11 = arith.constant 2.000000e-01 : f32
    %15 = vector.broadcast %cst_11 : f32 to vector<16x128xf32>
    %16 = arith.mulf %15, %14 : vector<16x128xf32>
    %17 = arith.maximumf %14, %16 : vector<16x128xf32>
    %18 = arith.truncf %17 : vector<16x128xf32> to vector<16x128xbf16>
    %c0_12 = arith.constant 0 : index
    %c0_13 = arith.constant 0 : index
    %19 = vector.load %arg6[%c0_12, %c0_13] : memref<128x1024xbf16, #tpu.memory_space<vmem>>, vector<128x1024xbf16>
    %cst_14 = arith.constant dense<0.000000e+00> : vector<16x1024xf32>
    %20 = tpu.matmul %18, %19, %cst_14 {dimension_numbers = #tpu.dot_dimension_numbers<[1], [0], [0], [1], [0, 0, 1, 1], [], []>} : vector<16x128xbf16>, vector<128x1024xbf16>, vector<16x1024xf32> -> vector<16x1024xf32>
    %c0_15 = arith.constant 0 : index
    %c0_16 = arith.constant 0 : index
    %21 = vector.load %arg7[%c0_15, %c0_16] : memref<1x1024xf32, #tpu.memory_space<vmem>>, vector<1x1024xf32>
    %22 = vector.broadcast %21 : vector<1x1024xf32> to vector<16x1024xf32>
    %23 = arith.addf %20, %22 : vector<16x1024xf32>
    %cst_17 = arith.constant 5.000000e-01 : f32
    %24 = vector.broadcast %cst_17 : f32 to vector<16x1024xf32>
    %25 = arith.mulf %24, %23 : vector<16x1024xf32>
    %26 = math.tanh %25 : vector<16x1024xf32>
    %cst_18 = arith.constant 5.000000e-01 : f32
    %27 = vector.broadcast %cst_18 : f32 to vector<16x1024xf32>
    %28 = arith.mulf %27, %26 : vector<16x1024xf32>
    %cst_19 = arith.constant 5.000000e-01 : f32
    %29 = vector.broadcast %cst_19 : f32 to vector<16x1024xf32>
    %30 = arith.addf %28, %29 : vector<16x1024xf32>
    %31 = arith.truncf %30 : vector<16x1024xf32> to vector<16x1024xbf16>
    %c0_20 = arith.constant 0 : index
    %c0_21 = arith.constant 0 : index
    %32 = vector.load %arg8[%c0_20, %c0_21] : memref<16x1024xbf16, #tpu.memory_space<vmem>>, vector<16x1024xbf16>
    tpu.vector_store %arg8[%c0_20, %c0_21], %31 {strides = array<i32>} : memref<16x1024xbf16, #tpu.memory_space<vmem>>, vector<16x1024xbf16>,
    return
  }
  func.func @transform_0(%arg0: i32) -> (i32, i32) {
    %c0_i32 = arith.constant 0 : i32
    %c0_i32_0 = arith.constant 0 : i32
    return %arg0, %c0_i32 : i32, i32
  }
  func.func @transform_1(%arg0: i32) -> (i32, i32) {
    %c0_i32 = arith.constant 0 : i32
    %c0_i32_0 = arith.constant 0 : i32
    %c0_i32_1 = arith.constant 0 : i32
    return %c0_i32, %c0_i32_0 : i32, i32
  }
  func.func @transform_2(%arg0: i32) -> (i32, i32) {
    %c0_i32 = arith.constant 0 : i32
    %c0_i32_0 = arith.constant 0 : i32
    %c0_i32_1 = arith.constant 0 : i32
    return %c0_i32, %c0_i32_0 : i32, i32
  }
  func.func @transform_3(%arg0: i32) -> (i32, i32) {
    %c0_i32 = arith.constant 0 : i32
    %c0_i32_0 = arith.constant 0 : i32
    %c0_i32_1 = arith.constant 0 : i32
    return %c0_i32, %c0_i32_0 : i32, i32
  }
  func.func @transform_4(%arg0: i32) -> (i32, i32) {
    %c0_i32 = arith.constant 0 : i32
    %c0_i32_0 = arith.constant 0 : i32
    %c0_i32_1 = arith.constant 0 : i32
    return %c0_i32, %c0_i32_0 : i32, i32
  }
  func.func @transform_5(%arg0: i32) -> (i32, i32) {
    %c0_i32 = arith.constant 0 : i32
    %c0_i32_0 = arith.constant 0 : i32
    %c0_i32_1 = arith.constant 0 : i32
    return %c0_i32, %c0_i32_0 : i32, i32
  }
  func.func @transform_6(%arg0: i32) -> (i32, i32) {
    %c0_i32 = arith.constant 0 : i32
    %c0_i32_0 = arith.constant 0 : i32
    %c0_i32_1 = arith.constant 0 : i32
    return %c0_i32, %c0_i32_0 : i32, i32
  }
  func.func @transform_7(%arg0: i32) -> (i32, i32) {
    %c0_i32 = arith.constant 0 : i32
    %c0_i32_0 = arith.constant 0 : i32
    return %arg0, %c0_i32 : i32, i32
  }
}

</mosaic_0001>

<bundles_post_ra>
// kernel: decoder_fc_forward.1
= control target key start
LH: loop header
LB: loop body
LE: loop exit
PB: predicated region body
PF: predicated region fallthrough
CT: control target
= control target key end

     0   :  { %vm54_vm0 = vcmask 261120   ;;  %s1672_s1 = inlined_call_operand.vmem [shape: bf16[32,128], index: 1, kind: input, shape index: {}]   ;;  %s1673_s3 = inlined_call_operand.vmem [shape: bf16[128,128], index: 3, kind: input, shape index: {}]   ;;  %s1674_s2 = inlined_call_operand.vmem [shape: f32[1,128], index: 2, kind: input, shape index: {}]   ;;  %s1675_s0 = inlined_call_operand.vmem [shape: bf16[16,32], index: 0, kind: input, shape index: {}]   ;;  %s1676_s4 = inlined_call_operand.vmem [shape: f32[1,128], index: 4, kind: input, shape index: {}]   ;;  %s1677_s5 = inlined_call_operand.vmem [shape: bf16[128,1024], index: 5, kind: input, shape index: {}]   ;;  %s1678_s6 = inlined_call_operand.vmem [shape: f32[1,1024], index: 6, kind: input, shape index: {}]   ;;  %s1679_s7 = inlined_call_operand.vmem [shape: bf16[16,1024], index: 7, kind: output, shape index: {}]  }
   0x1   :  { %v1065_v0 = vld [vmem:[%s1672_s1 + $0x8] sm:$0xff]  ;;  %v1073_v1 = vld [vmem:[%s1673_s3 + $0x38] sm:$0xff]  ;;  %v1064_v2 = vld [vmem:[%s1672_s1] sm:$0xff] }
   0x2   :  { %64 = vmatpush.bf16.msra.mxu0 %v1065_v0  ;;  %145 = vmatpush.bf16.msra.mxu1 %v1073_v1  ;;  %v1072_v3 = vld [vmem:[%s1673_s3 + $0x30] sm:$0xff]  ;;  %v1063_v4 = vld [vmem:[%s1675_s0] sm:$0xff]  ;;  %v1071_v5 = vld [vmem:[%s1673_s3 + $0x28] sm:$0xff] }
   0x3   :  { %v1070_v6 = vld [vmem:[%s1673_s3 + $0x20] sm:$0xff]  ;;  %v1069_v7 = vld [vmem:[%s1673_s3 + $0x18] sm:$0xff]  ;;  %v1068_v8 = vld [vmem:[%s1673_s3 + $0x10] sm:$0xff] }
   0x4   :  { %v1067_v9 = vld [vmem:[%s1673_s3 + $0x8] sm:$0xff]  ;;  %v1066_v10 = vld [vmem:[%s1673_s3] sm:$0xff] }
   0x5   :  { %v1033_v11 = vld [vmem:[%s1677_s5 + $0x1c0] sm:$0xf]  ;;  %v1130_v13 = vld [vmem:[%s1677_s5 + $0x1c4] sm:$0xf]  ;;  %v1041_v16 = vld [vmem:[%s1677_s5 + $0x1c8] sm:$0xf] }
   0x6   :  { %65 = vmatpush.bf16.msra.mxu0 %v1064_v2  ;;  %146 = vmatpush.bf16.msra.mxu1 %v1072_v3  ;;  %v1134_v12 = vld [vmem:[%s1677_s5 + $0x1dc] sm:$0xf0]  ;;  %v1035_v15 = vld [vmem:[%s1677_s5 + $0x1e0] sm:$0xf0]  ;;  %v1135_v17 = vld [vmem:[%s1677_s5 + $0x1e4] sm:$0xf0] }
   0x7   :  { %v1034_v14 = vor.u32 %v1134_v12, %v1033_v11  ;;  %v1038_v18 = vor.u32 %v1130_v13, %v1035_v15  ;;  %v1042_v19 = vor.u32 %v1135_v17, %v1041_v16  ;;  %v1131_v20 = vld [vmem:[%s1677_s5 + $0x1cc] sm:$0xf]  ;;  %v1001_v22 = vld [vmem:[%s1677_s5 + $0x180] sm:$0xf]  ;;  %v1122_v25 = vld [vmem:[%s1677_s5 + $0x184] sm:$0xf] }
   0x8   :  { %v1043_v21 = vld [vmem:[%s1677_s5 + $0x1e8] sm:$0xf0]  ;;  %v1126_v24 = vld [vmem:[%s1677_s5 + $0x19c] sm:$0xf0]  ;;  %v1003_v26 = vld [vmem:[%s1677_s5 + $0x1a0] sm:$0xf0] }
   0x9   :  { %774 = vmatmul.msk.bf16.vlgmr.msra.gmra.mxu0 %vm54_vm0, %v1063_v4  ;;  %566 = vmatpush.bf16.msra.mxu2 %v1034_v14  ;;  %v1046_v23 = vor.u32 %v1131_v20, %v1043_v21  ;;  %v1002_v27 = vor.u32 %v1126_v24, %v1001_v22  ;;  %v1006_v28 = vor.u32 %v1122_v25, %v1003_v26  ;;  %v1009_v29 = vld [vmem:[%s1677_s5 + $0x188] sm:$0xf]  ;;  %v1123_v31 = vld [vmem:[%s1677_s5 + $0x18c] sm:$0xf]  ;;  %v969_v34 = vld [vmem:[%s1677_s5 + $0x140] sm:$0xf] }
   0xa   :  { %147 = vmatpush.bf16.msra.mxu1 %v1071_v5  ;;  %580 = vmatpush.bf16.msra.mxu3 %v1038_v18  ;;  %v1127_v30 = vld [vmem:[%s1677_s5 + $0x1a4] sm:$0xf0]  ;;  %v1011_v33 = vld [vmem:[%s1677_s5 + $0x1a8] sm:$0xf0]  ;;  %v1118_v35 = vld [vmem:[%s1677_s5 + $0x15c] sm:$0xf0] }
   0xb   :  { %594 = vmatpush.bf16.msrb.mxu0 %v1042_v19  ;;  %v1010_v32 = vor.u32 %v1127_v30, %v1009_v29  ;;  %v1014_v36 = vor.u32 %v1123_v31, %v1011_v33  ;;  %v1114_v37 = vld [vmem:[%s1677_s5 + $0x144] sm:$0xf]  ;;  %v977_v39 = vld [vmem:[%s1677_s5 + $0x148] sm:$0xf]  ;;  %v970_v40 = vor.u32 %v1118_v35, %v969_v34  ;;  %v1115_v42 = vld [vmem:[%s1677_s5 + $0x14c] sm:$0xf] }
   0xc   :  { %v971_v38 = vld [vmem:[%s1677_s5 + $0x160] sm:$0xf0]  ;;  %v1119_v41 = vld [vmem:[%s1677_s5 + $0x164] sm:$0xf0]  ;;  %v979_v43 = vld [vmem:[%s1677_s5 + $0x168] sm:$0xf0] }
   0xd   :  { %567 = vmatpush.bf16.msra.mxu2 %v1002_v27  ;;  %v974_v44 = vor.u32 %v1114_v37, %v971_v38  ;;  %v978_v45 = vor.u32 %v1119_v41, %v977_v39  ;;  %v937_v46 = vld [vmem:[%s1677_s5 + $0x100] sm:$0xf]  ;;  %v1106_v48 = vld [vmem:[%s1677_s5 + $0x104] sm:$0xf]  ;;  %v982_v49 = vor.u32 %v1115_v42, %v979_v43  ;;  %v945_v51 = vld [vmem:[%s1677_s5 + $0x108] sm:$0xf] }
   0xe   :  { %148 = vmatpush.bf16.msra.mxu1 %v1070_v6  ;;  %581 = vmatpush.bf16.msra.mxu3 %v1006_v28  ;;  %v1110_v47 = vld [vmem:[%s1677_s5 + $0x11c] sm:$0xf0]  ;;  %v939_v50 = vld [vmem:[%s1677_s5 + $0x120] sm:$0xf0]  ;;  %v1111_v52 = vld [vmem:[%s1677_s5 + $0x124] sm:$0xf0] }
   0xf   :  { %595 = vmatpush.bf16.msrb.mxu0 %v1010_v32  ;;  %v1107_v53 = vld [vmem:[%s1677_s5 + $0x10c] sm:$0xf]  ;;  %v938_v55 = vor.u32 %v1110_v47, %v937_v46  ;;  %v942_v56 = vor.u32 %v1106_v48, %v939_v50  ;;  %v946_v57 = vor.u32 %v1111_v52, %v945_v51  ;;  %v905_v58 = vld [vmem:[%s1677_s5 + $0xc0] sm:$0xf]  ;;  %v1098_v60 = vld [vmem:[%s1677_s5 + $0xc4] sm:$0xf] }
  0x10   :  { %v947_v54 = vld [vmem:[%s1677_s5 + $0x128] sm:$0xf0]  ;;  %v1102_v59 = vld [vmem:[%s1677_s5 + $0xdc] sm:$0xf0]  ;;  %v907_v62 = vld [vmem:[%s1677_s5 + $0xe0] sm:$0xf0] }
  0x11   :  { %568 = vmatpush.bf16.msra.mxu2 %v970_v40  ;;  %v950_v61 = vor.u32 %v1107_v53, %v947_v54  ;;  %v913_v63 = vld [vmem:[%s1677_s5 + $0xc8] sm:$0xf]  ;;  %v1099_v1 = vld [vmem:[%s1677_s5 + $0xcc] sm:$0xf]  ;;  %v1138_v3 = vld [vmem:[%s1674_s2] ss:$0 sm:$0xff]  ;;  %v906_v5 = vor.u32 %v1102_v59, %v905_v58  ;;  %v910_v6 = vor.u32 %v1098_v60, %v907_v62 }
  0x12   :  { %149 = vmatpush.bf16.msra.mxu1 %v1069_v7  ;;  %582 = vmatpush.bf16.msra.mxu3 %v974_v44  ;;  %v1103_v0 = vld [vmem:[%s1677_s5 + $0xe4] sm:$0xf0]  ;;  %v915_v2 = vld [vmem:[%s1677_s5 + $0xe8] sm:$0xf0]  ;;  %v875_v12 = vld [vmem:[%s1677_s5 + $0xa0] sm:$0xf0] }
  0x13   :  { %596 = vmatpush.bf16.msrb.mxu0 %v978_v45  ;;  %v914_v7 = vor.u32 %v1103_v0, %v913_v63  ;;  %v918_v11 = vor.u32 %v1099_v1, %v915_v2  ;;  %v881_v13 = vld [vmem:[%s1677_s5 + $0x88] sm:$0xf]  ;;  %v1091_v15 = vld [vmem:[%s1677_s5 + $0x8c] sm:$0xf]  ;;  %v841_v21 = vld [vmem:[%s1677_s5 + $0x40] sm:$0xf] }
  0x14   :  { %v1095_v14 = vld [vmem:[%s1677_s5 + $0xa4] sm:$0xf0]  ;;  %v883_v16 = vld [vmem:[%s1677_s5 + $0xa8] sm:$0xf0]  ;;  %v1086_v22 = vld [vmem:[%s1677_s5 + $0x5c] sm:$0xf0] }
  0x15   :  { %569 = vmatpush.bf16.msra.mxu2 %v938_v55  ;;  %v882_v20 = vor.u32 %v1095_v14, %v881_v13  ;;  %v886_v24 = vor.u32 %v1091_v15, %v883_v16  ;;  %v843_v25 = vld [vmem:[%s1677_s5 + $0x60] sm:$0xf0]  ;;  %v849_v26 = vld [vmem:[%s1677_s5 + $0x48] sm:$0xf]  ;;  %v1083_v28 = vld [vmem:[%s1677_s5 + $0x4c] sm:$0xf]  ;;  %v842_v31 = vor.u32 %v1086_v22, %v841_v21 }
  0x16   :  { %150 = vmatpush.bf16.msra.mxu1 %v1068_v8  ;;  %583 = vmatpush.bf16.msra.mxu3 %v942_v56  ;;  %v873_v8 = vld [vmem:[%s1677_s5 + $0x80] sm:$0xf]  ;;  %v1087_v27 = vld [vmem:[%s1677_s5 + $0x64] sm:$0xf0]  ;;  %v851_v29 = vld [vmem:[%s1677_s5 + $0x68] sm:$0xf0] }
  0x17   :  { %597 = vmatpush.bf16.msrb.mxu0 %v946_v57  ;;  %v850_v35 = vor.u32 %v1087_v27, %v849_v26  ;;  %v809_v41 = vld [vmem:[%s1677_s5] sm:$0xf]  ;;  %v1074_v43 = vld [vmem:[%s1677_s5 + $0x4] sm:$0xf]  ;;  %v817_v46 = vld [vmem:[%s1677_s5 + $0x8] sm:$0xf] }
  0x18   :  { %v1078_v42 = vld [vmem:[%s1677_s5 + $0x1c] sm:$0xf0]  ;;  %v811_v45 = vld [vmem:[%s1677_s5 + $0x20] sm:$0xf0]  ;;  %v1079_v47 = vld [vmem:[%s1677_s5 + $0x24] sm:$0xf0] }
  0x19   :  { %570 = vmatpush.bf16.msra.mxu2 %v906_v5  ;;  %v810_v44 = vor.u32 %v1078_v42, %v809_v41  ;;  %v814_v48 = vor.u32 %v1074_v43, %v811_v45  ;;  %v1075_v50 = vld [vmem:[%s1677_s5 + $0xc] sm:$0xf]  ;;  %v1049_v52 = vld [vmem:[%s1677_s5 + $0x1d0] sm:$0xf]  ;;  %v1132_v55 = vld [vmem:[%s1677_s5 + $0x1d4] sm:$0xf] }
  0x1a   :  { %151 = vmatpush.bf16.msra.mxu1 %v1067_v9  ;;  %v1094_v9 = vld [vmem:[%s1677_s5 + $0x9c] sm:$0xf0]  ;;  %584 = vmatpush.bf16.msra.mxu3 %v910_v6  ;;  %v819_v51 = vld [vmem:[%s1677_s5 + $0x28] sm:$0xf0]  ;;  %v1136_v54 = vld [vmem:[%s1677_s5 + $0x1ec] sm:$0xf0] }
  0x1b   :  { %v874_v17 = vor.u32 %v1094_v9, %v873_v8  ;;  %598 = vmatpush.bf16.msrb.mxu0 %v914_v7  ;;  %v822_v53 = vor.u32 %v1075_v50, %v819_v51  ;;  %v1051_v56 = vld [vmem:[%s1677_s5 + $0x1f0] sm:$0xf0]  ;;  %v1050_v57 = vor.u32 %v1136_v54, %v1049_v52  ;;  %v1057_v59 = vld [vmem:[%s1677_s5 + $0x1d8] sm:$0xf]  ;;  %v1059_v63 = vld [vmem:[%s1677_s5 + $0x1f8] sm:$0xf0] }
  0x1c   :  { %v1054_v58 = vor.u32 %v1132_v55, %v1051_v56  ;;  %v1137_v60 = vld [vmem:[%s1677_s5 + $0x1f4] sm:$0xf0]  ;;  %v1017_v0 = vld [vmem:[%s1677_s5 + $0x190] sm:$0xf]  ;;  %v1019_v5 = vld [vmem:[%s1677_s5 + $0x1b0] sm:$0xf0] }
  0x1d   :  { %571 = vmatpush.bf16.msra.mxu2 %v874_v17  ;;  %v1058_v62 = vor.u32 %v1137_v60, %v1057_v59  ;;  %v1128_v1 = vld [vmem:[%s1677_s5 + $0x1ac] sm:$0xf0]  ;;  %v1025_v6 = vld [vmem:[%s1677_s5 + $0x198] sm:$0xf]  ;;  %v1125_v9 = vld [vmem:[%s1677_s5 + $0x19c] sm:$0xf] }
  0x1e   :  { %152 = vmatpush.bf16.msra.mxu1 %v1066_v10  ;;  %v1090_v10 = vld [vmem:[%s1677_s5 + $0x84] sm:$0xf]  ;;  %v1129_v8 = vld [vmem:[%s1677_s5 + $0x1b4] sm:$0xf0]  ;;  %v985_v13 = vld [vmem:[%s1677_s5 + $0x150] sm:$0xf] }
  0x1f   :  { %v878_v19 = vor.u32 %v1090_v10, %v875_v12  ;;  %599 = vmatpush.bf16.msrb.mxu0 %v882_v20  ;;  %v1027_v10 = vld [vmem:[%s1677_s5 + $0x1b8] sm:$0xf0]  ;;  %v1120_v14 = vld [vmem:[%s1677_s5 + $0x16c] sm:$0xf0]  ;;  %v1116_v15 = vld [vmem:[%s1677_s5 + $0x154] sm:$0xf] }
  0x20   :  { %v1030_v12 = vor.u32 %v1125_v9, %v1027_v10  ;;  %v986_v16 = vor.u32 %v1120_v14, %v985_v13  ;;  %v987_v17 = vld [vmem:[%s1677_s5 + $0x170] sm:$0xf0]  ;;  %v1117_v22 = vld [vmem:[%s1677_s5 + $0x15c] sm:$0xf]  ;;  %v1112_v26 = vld [vmem:[%s1677_s5 + $0x12c] sm:$0xf0] }
  0x21   :  { %585 = vmatpush.bf16.msra.mxu3 %v878_v19  ;;  %572 = vmatpush.bf16.msra.mxu2 %v842_v31  ;;  %v1121_v19 = vld [vmem:[%s1677_s5 + $0x174] sm:$0xf0]  ;;  %v990_v20 = vor.u32 %v1116_v15, %v987_v17  ;;  %v1108_v27 = vld [vmem:[%s1677_s5 + $0x114] sm:$0xf]  ;;  %v1096_v50 = vld [vmem:[%s1677_s5 + $0xac] sm:$0xf0] }
  0x22   :  { %608 = vmatpush.bf16.msrb.mxu1 %v1046_v23  ;;  %v1082_v23 = vld [vmem:[%s1677_s5 + $0x44] sm:$0xf]  ;;  %v1113_v31 = vld [vmem:[%s1677_s5 + $0x134] sm:$0xf0]  ;;  %v923_v41 = vld [vmem:[%s1677_s5 + $0xf0] sm:$0xf0] }
  0x23   :  { %v846_v34 = vor.u32 %v1082_v23, %v843_v25  ;;  %600 = vmatpush.bf16.msrb.mxu0 %v850_v35  ;;  %v995_v23 = vld [vmem:[%s1677_s5 + $0x178] sm:$0xf0]  ;;  %v953_v25 = vld [vmem:[%s1677_s5 + $0x110] sm:$0xf]  ;;  %v929_v42 = vld [vmem:[%s1677_s5 + $0xd8] sm:$0xf] }
  0x24   :  { %v963_v35 = vld [vmem:[%s1677_s5 + $0x138] sm:$0xf0]  ;;  %v1105_v43 = vld [vmem:[%s1677_s5 + $0xf4] sm:$0xf0]  ;;  %v1092_v51 = vld [vmem:[%s1677_s5 + $0x94] sm:$0xf] }
  0x25   :  { %586 = vmatpush.bf16.msra.mxu3 %v846_v34  ;;  %573 = vmatpush.bf16.msra.mxu2 %v810_v44  ;;  %v1109_v34 = vld [vmem:[%s1677_s5 + $0x11c] sm:$0xf]  ;;  %v930_v45 = vor.u32 %v1105_v43, %v929_v42  ;;  %v891_v52 = vld [vmem:[%s1677_s5 + $0xb0] sm:$0xf0]  ;;  %v897_v55 = vld [vmem:[%s1677_s5 + $0x98] sm:$0xf] }
  0x26   :  { %609 = vmatpush.bf16.msrb.mxu1 %v1014_v36  ;;  %v854_v36 = vor.u32 %v1083_v28, %v851_v29  ;;  %v954_v28 = vor.u32 %v1112_v26, %v953_v25  ;;  %v955_v29 = vld [vmem:[%s1677_s5 + $0x130] sm:$0xf0]  ;;  %v894_v54 = vor.u32 %v1092_v51, %v891_v52  ;;  %v1097_v56 = vld [vmem:[%s1677_s5 + $0xb4] sm:$0xf0]  ;;  %v899_v59 = vld [vmem:[%s1677_s5 + $0xb8] sm:$0xf0] }
  0x27   :  { %v857_v60 = vld [vmem:[%s1677_s5 + $0x50] sm:$0xf]  ;;  %v1076_v10 = vld [vmem:[%s1677_s5 + $0x14] sm:$0xf]  ;;  %v833_v13 = vld [vmem:[%s1677_s5 + $0x18] sm:$0xf] }
  0x28   :  { %v1080_v9 = vld [vmem:[%s1677_s5 + $0x2c] sm:$0xf0]  ;;  %v1081_v14 = vld [vmem:[%s1677_s5 + $0x34] sm:$0xf0]  ;;  %v1077_v15 = vld [vmem:[%s1677_s5 + $0x1c] sm:$0xf] }
  0x29   :  { %587 = vmatpush.bf16.msra.mxu3 %v814_v48  ;;  %622 = vmatpush.bf16.msrb.mxu2 %v1050_v57  ;;  %v889_v48 = vld [vmem:[%s1677_s5 + $0x90] sm:$0xf]  ;;  %v1093_v57 = vld [vmem:[%s1677_s5 + $0x9c] sm:$0xf] }
  0x2a   :  { %610 = vmatpush.bf16.msrb.mxu1 %v982_v49  ;;  %v818_v49 = vor.u32 %v1079_v47, %v817_v46  ;;  %v1101_v46 = vld [vmem:[%s1677_s5 + $0xdc] sm:$0xf] }
  0x2b   :  { %v931_v47 = vld [vmem:[%s1677_s5 + $0xf8] sm:$0xf0] }
  0x2c   :  { %601 = vmatpush.bf16.msrb.mxu0 %v818_v49  ;;  %v934_v49 = vor.u32 %v1101_v46, %v931_v47 }
  0x2d   :  { %636 = vmatpush.bf16.msrb.mxu3 %v1054_v58  ;;  %v898_v58 = vor.u32 %v1097_v56, %v897_v55 }
  0x2e   :  { %611 = vmatpush.bf16.msrb.mxu1 %v950_v61  ;;  %v1133_v61 = vld [vmem:[%s1677_s5 + $0x1dc] sm:$0xf] }
  0x2f   :  { %v1062_v2 = vor.u32 %v1133_v61, %v1059_v63  ;;  %v1088_v61 = vld [vmem:[%s1677_s5 + $0x6c] sm:$0xf0]  ;;  %v1084_v63 = vld [vmem:[%s1677_s5 + $0x54] sm:$0xf] }
  0x30   :  { %650 = vmatpush.bf16.msra.mxu0 %v1058_v62  ;;  %v902_v62 = vor.u32 %v1093_v57, %v899_v59 }
  0x32   :  { %612 = vmatpush.bf16.msrb.mxu1 %v918_v11  ;;  %v1026_v11 = vor.u32 %v1129_v8, %v1025_v6 }
  0x34   :  { %651 = vmatpush.bf16.msra.mxu0 %v1026_v11  ;;  %v827_v11 = vld [vmem:[%s1677_s5 + $0x30] sm:$0xf0] }
  0x36   :  { %613 = vmatpush.bf16.msrb.mxu1 %v886_v24  ;;  %v998_v24 = vor.u32 %v1117_v22, %v995_v23  ;;  %v1139_v22 = vld [vmem:[%s1676_s4] ss:$0 sm:$0xff] }
  0x3a   :  { %614 = vmatpush.bf16.msrb.mxu1 %v854_v36  ;;  %v966_v36 = vor.u32 %v1109_v34, %v963_v35 }
  0x3e   :  { %615 = vmatpush.bf16.msrb.mxu1 %v822_v53  ;;  %v890_v53 = vor.u32 %v1096_v50, %v889_v48 }
  0x86   :  { %v67_v4 = vpop.f32.mrf.mxu0 }
  0x87   :  { %v68_v18 = vadd.f32 %v1138_v3, %v67_v4  ;;  %v1124_v4 = vld [vmem:[%s1677_s5 + $0x194] sm:$0xf] }
  0x88   :  { %v1022_v7 = vor.u32 %v1124_v4, %v1019_v5  ;;  %v867_v4 = vld [vmem:[%s1677_s5 + $0x78] sm:$0xf0]  ;;  %v858_v5 = vor.u32 %v1088_v61, %v857_v60 }
  0x89   :  { %v72_v32 = vmul.f32 0.2, %v68_v18 }
  0x8a   :  { %637 = vmatpush.bf16.msrb.mxu3 %v1022_v7  ;;  %v825_v7 = vld [vmem:[%s1677_s5 + $0x10] sm:$0xf] }
  0x8b   :  { %v74_v38 = vmax.f32 %v68_v18, %v72_v32  ;;  %v993_v18 = vld [vmem:[%s1677_s5 + $0x158] sm:$0xf]  ;;  %v958_v32 = vor.u32 %v1108_v27, %v955_v29  ;;  %v826_v17 = vor.u32 %v1080_v9, %v825_v7 }
  0x8c   :  { %v994_v21 = vor.u32 %v1121_v19, %v993_v18  ;;  %v830_v18 = vor.u32 %v1076_v10, %v827_v11  ;;  %v834_v19 = vor.u32 %v1081_v14, %v833_v13 }
  0x8e   :  { %v69_v30 = vpop.f32.mrf.mxu0  ;;  %638 = vmatpush.bf16.msrb.mxu3 %v990_v20  ;;  %652 = vmatpush.bf16.msra.mxu0 %v994_v21 }
  0x8f   :  { %v70_v33 = vadd.f32 %v1138_v3, %v69_v30  ;;  %v1018_v3 = vor.u32 %v1128_v1, %v1017_v0  ;;  %v961_v30 = vld [vmem:[%s1677_s5 + $0x118] sm:$0xf]  ;;  %v859_v0 = vld [vmem:[%s1677_s5 + $0x70] sm:$0xf0] }
  0x90   :  { %v865_v1 = vld [vmem:[%s1677_s5 + $0x58] sm:$0xf]  ;;  %v862_v6 = vor.u32 %v1084_v63, %v859_v0 }
  0x91   :  { %v73_v37 = vmul.f32 0.2, %v70_v33  ;;  %623 = vmatpush.bf16.msrb.mxu2 %v1018_v3  ;;  %v1085_v3 = vld [vmem:[%s1677_s5 + $0x5c] sm:$0xf] }
  0x92   :  { %639 = vmatpush.bf16.msrb.mxu3 %v958_v32 }
  0x93   :  { %v75_v39 = vmax.f32 %v70_v33, %v73_v37  ;;  %v962_v33 = vor.u32 %v1113_v31, %v961_v30  ;;  %v921_v37 = vld [vmem:[%s1677_s5 + $0xd0] sm:$0xf]  ;;  %v1638_v31 = vld [vmem:[%s1678_s6] sm:$0xff] }
  0x94   :  { %v232_v32 = vperm.slane %v1638_v31, 2  ;;  %v236_v60 = vperm.slane %v1638_v31, 6  ;;  %v237_v61 = vperm.slane %v1638_v31, 7  ;;  %v234_v13 = vperm.slane %v1638_v31, 4 }
  0x95   :  { %v76_v40 = vpack.c.bf16 %v75_v39, %v74_v38  ;;  %624 = vmatpush.bf16.msrb.mxu2 %v986_v16  ;;  %v1104_v38 = vld [vmem:[%s1677_s5 + $0xec] sm:$0xf0]  ;;  %v1100_v39 = vld [vmem:[%s1677_s5 + $0xd4] sm:$0xf]  ;;  %653 = vmatpush.bf16.msra.mxu0 %v962_v33  ;;  %v835_v16 = vld [vmem:[%s1677_s5 + $0x38] sm:$0xf0] }
  0x96   :  { %v926_v44 = vor.u32 %v1100_v39, %v923_v41  ;;  %v838_v20 = vor.u32 %v1077_v15, %v835_v16  ;;  %v233_v33 = vperm.slane %v1638_v31, 3  ;;  %v231_v39 = vperm.slane %v1638_v31, 1 }
  0x97   :  { %153 = vmatmul.bf16.vlgmr.msra.gmra.mxu1 %v76_v40  ;;  %v922_v40 = vor.u32 %v1104_v38, %v921_v37  ;;  %v230_v38 = vperm.slane %v1638_v31, 0  ;;  %v235_v14 = vperm.slane %v1638_v31, 5 }
  0x98   :  { %664 = vmatpush.bf16.msra.mxu1 %v1062_v2  ;;  %640 = vmatpush.bf16.msrb.mxu3 %v926_v44  ;;  %v1089_v2 = vld [vmem:[%s1677_s5 + $0x74] sm:$0xf0] }
  0x99   :  { %625 = vmatpush.bf16.msrb.mxu2 %v954_v28  ;;  %654 = vmatpush.bf16.msra.mxu0 %v930_v45  ;;  %v866_v8 = vor.u32 %v1089_v2, %v865_v1 }
  0x9c   :  { %665 = vmatpush.bf16.msra.mxu1 %v1030_v12  ;;  %641 = vmatpush.bf16.msrb.mxu3 %v894_v54  ;;  %v870_v12 = vor.u32 %v1085_v3, %v867_v4 }
  0x9d   :  { %626 = vmatpush.bf16.msrb.mxu2 %v922_v40  ;;  %655 = vmatpush.bf16.msra.mxu0 %v898_v58 }
  0xa0   :  { %666 = vmatpush.bf16.msra.mxu1 %v998_v24  ;;  %642 = vmatpush.bf16.msrb.mxu3 %v862_v6 }
  0xa1   :  { %627 = vmatpush.bf16.msrb.mxu2 %v890_v53  ;;  %656 = vmatpush.bf16.msra.mxu0 %v866_v8 }
  0xa4   :  { %667 = vmatpush.bf16.msra.mxu1 %v966_v36  ;;  %643 = vmatpush.bf16.msrb.mxu3 %v830_v18 }
  0xa5   :  { %628 = vmatpush.bf16.msrb.mxu2 %v858_v5  ;;  %657 = vmatpush.bf16.msra.mxu0 %v834_v19 }
  0xa8   :  { %668 = vmatpush.bf16.msra.mxu1 %v934_v49 }
  0xa9   :  { %629 = vmatpush.bf16.msrb.mxu2 %v826_v17 }
  0xac   :  { %669 = vmatpush.bf16.msra.mxu1 %v902_v62 }
  0xb0   :  { %670 = vmatpush.bf16.msra.mxu1 %v870_v12 }
  0xb4   :  { %671 = vmatpush.bf16.msra.mxu1 %v838_v20 }
 0x114   :  { %v154_v21 = vpop.f32.mrf.mxu1 }
 0x115   :  { %v155_v23 = vadd.f32 %v1139_v22, %v154_v21 }
 0x117   :  { %v159_v25 = vmul.f32 0.2, %v155_v23 }
 0x119   :  { %v161_v28 = vmax.f32 %v155_v23, %v159_v25 }
 0x11c   :  { %v156_v24 = vpop.f32.mrf.mxu1 }
 0x11d   :  { %v157_v26 = vadd.f32 %v1139_v22, %v156_v24 }
 0x11f   :  { %v160_v27 = vmul.f32 0.2, %v157_v26 }
 0x121   :  { %v162_v29 = vmax.f32 %v157_v26, %v160_v27 }
 0x123   :  { %v163_v30 = vpack.c.bf16 %v162_v29, %v161_v28 }
 0x125   :  { %574 = vmatmul.bf16.vlgmr.msra.gmra.mxu2 %v163_v30  ;;  %588 = vmatmul.bf16.vlgmr.msra.gmra.mxu3 %v163_v30 }
 0x126   :  { %602 = vmatmul.bf16.vlgmr.msrb.gmra.mxu0 %v163_v30  ;;  %616 = vmatmul.bf16.vlgmr.msrb.gmra.mxu1 %v163_v30 }
 0x135   :  { %630 = vmatmul.bf16.vlgmr.msrb.gmra.mxu2 %v163_v30  ;;  %644 = vmatmul.bf16.vlgmr.msrb.gmra.mxu3 %v163_v30 }
 0x136   :  { %658 = vmatmul.bf16.vlgmr.msra.gmra.mxu0 %v163_v30  ;;  %672 = vmatmul.bf16.vlgmr.msra.gmra.mxu1 %v163_v30 }
 0x1a3   :  { %v603_v34 = vpop.f32.mrf.mxu0  ;;  %v617_v35 = vpop.f32.mrf.mxu1 }
 0x1a4   :  { %v604_v36 = vadd.f32 %v603_v34, %v232_v32  ;;  %v618_v37 = vadd.f32 %v617_v35, %v233_v33 }
 0x1a6   :  { %v680_v40 = vmul.f32 0.5, %v604_v36  ;;  %v681_v41 = vmul.f32 0.5, %v618_v37 }
 0x1a8   :  { %1140 = vtanh.f32 %v680_v40  ;;  %v575_v42 = vpop.f32.mrf.mxu2  ;;  %v589_v43 = vpop.f32.mrf.mxu3 }
 0x1a9   :  { %1142 = vtanh.f32 %v681_v41  ;;  %v576_v44 = vadd.f32 %v575_v42, %v230_v38  ;;  %v590_v45 = vadd.f32 %v589_v43, %v231_v39 }
 0x1ab   :  { %v678_v46 = vmul.f32 0.5, %v576_v44  ;;  %v679_v47 = vmul.f32 0.5, %v590_v45  ;;  %v605_v48 = vpop.f32.mrf.mxu0  ;;  %v619_v49 = vpop.f32.mrf.mxu1 }
 0x1ac   :  { %v606_v50 = vadd.f32 %v605_v48, %v232_v32  ;;  %v620_v51 = vadd.f32 %v619_v49, %v233_v33 }
 0x1ad   :  { %1144 = vtanh.f32 %v678_v46 }
 0x1ae   :  { %v1141_v52 = vpop.eup %1140  ;;  %1146 = vtanh.f32 %v679_v47  ;;  %v688_v53 = vmul.f32 0.5, %v606_v50  ;;  %v689_v54 = vmul.f32 0.5, %v620_v51 }
 0x1af   :  { %v1143_v55 = vpop.eup %1142  ;;  %v712_v56 = vmul.f32 0.5, %v1141_v52 }
 0x1b0   :  { %v713_v57 = vmul.f32 0.5, %v1143_v55  ;;  %1148 = vtanh.f32 %v688_v53  ;;  %v577_v58 = vpop.f32.mrf.mxu2  ;;  %v591_v59 = vpop.f32.mrf.mxu3 }
 0x1b1   :  { %v728_v62 = vadd.f32 0.5, %v712_v56  ;;  %1150 = vtanh.f32 %v689_v54  ;;  %v578_v63 = vadd.f32 %v577_v58, %v230_v38  ;;  %v592_v0 = vadd.f32 %v591_v59, %v231_v39 }
 0x1b2   :  { %v729_v1 = vadd.f32 0.5, %v713_v57 }
 0x1b3   :  { %v1145_v2 = vpop.eup %1144  ;;  %v686_v3 = vmul.f32 0.5, %v578_v63  ;;  %v687_v4 = vmul.f32 0.5, %v592_v0  ;;  %v659_v5 = vpop.f32.mrf.mxu0 }
 0x1b4   :  { %v673_v6 = vpop.f32.mrf.mxu1  ;;  %v1147_v7 = vpop.eup %1146  ;;  %v743_v8 = vpack.c.bf16 %v729_v1, %v728_v62  ;;  %v710_v9 = vmul.f32 0.5, %v1145_v2  ;;  %v660_v10 = vadd.f32 %v659_v5, %v236_v60 }
 0x1b5   :  { %v674_v11 = vadd.f32 %v673_v6, %v237_v61  ;;  %v711_v12 = vmul.f32 0.5, %v1147_v7  ;;  %1152 = vtanh.f32 %v686_v3 }
 0x1b6   :  { %v1149_v15 = vpop.eup %1148  ;;  %751 = vst [vmem:[%s1679_s7 + $0x8] sm:$0xff] %v743_v8  ;;  %v726_v16 = vadd.f32 0.5, %v710_v9  ;;  %1154 = vtanh.f32 %v687_v4  ;;  %v684_v17 = vmul.f32 0.5, %v660_v10 }
 0x1b7   :  { %v685_v18 = vmul.f32 0.5, %v674_v11  ;;  %v1151_v19 = vpop.eup %1150  ;;  %v727_v20 = vadd.f32 0.5, %v711_v12  ;;  %v720_v21 = vmul.f32 0.5, %v1149_v15 }
 0x1b8   :  { %v721_v22 = vmul.f32 0.5, %v1151_v19  ;;  %1156 = vtanh.f32 %v684_v17  ;;  %v631_v23 = vpop.f32.mrf.mxu2  ;;  %v645_v24 = vpop.f32.mrf.mxu3 }
 0x1b9   :  { %v742_v25 = vpack.c.bf16 %v727_v20, %v726_v16  ;;  %v736_v26 = vadd.f32 0.5, %v720_v21  ;;  %1158 = vtanh.f32 %v685_v18  ;;  %v632_v27 = vadd.f32 %v631_v23, %v234_v13 }
 0x1ba   :  { %v737_v28 = vadd.f32 0.5, %v721_v22  ;;  %v646_v29 = vadd.f32 %v645_v24, %v235_v14 }
 0x1bb   :  { %v1153_v30 = vpop.eup %1152  ;;  %750 = vst [vmem:[%s1679_s7] sm:$0xff] %v742_v25  ;;  %v682_v31 = vmul.f32 0.5, %v632_v27  ;;  %v661_v32 = vpop.f32.mrf.mxu0 }
 0x1bc   :  { %v675_v33 = vpop.f32.mrf.mxu1  ;;  %v1155_v34 = vpop.eup %1154  ;;  %v747_v35 = vpack.c.bf16 %v737_v28, %v736_v26  ;;  %v718_v36 = vmul.f32 0.5, %v1153_v30  ;;  %v683_v37 = vmul.f32 0.5, %v646_v29  ;;  %v662_v38 = vadd.f32 %v661_v32, %v236_v60 }
 0x1bd   :  { %v719_v39 = vmul.f32 0.5, %v1155_v34  ;;  %1160 = vtanh.f32 %v682_v31  ;;  %v676_v40 = vadd.f32 %v675_v33, %v237_v61 }
 0x1be   :  { %v1157_v41 = vpop.eup %1156  ;;  %755 = vst [vmem:[%s1679_s7 + $0x28] sm:$0xff] %v747_v35  ;;  %v734_v42 = vadd.f32 0.5, %v718_v36  ;;  %1162 = vtanh.f32 %v683_v37  ;;  %v692_v43 = vmul.f32 0.5, %v662_v38 }
 0x1bf   :  { %v1159_v44 = vpop.eup %1158  ;;  %v735_v45 = vadd.f32 0.5, %v719_v39  ;;  %v716_v46 = vmul.f32 0.5, %v1157_v41  ;;  %v693_v47 = vmul.f32 0.5, %v676_v40 }
 0x1c0   :  { %v717_v48 = vmul.f32 0.5, %v1159_v44  ;;  %1164 = vtanh.f32 %v692_v43  ;;  %v633_v49 = vpop.f32.mrf.mxu2  ;;  %v647_v50 = vpop.f32.mrf.mxu3 }
 0x1c1   :  { %v746_v51 = vpack.c.bf16 %v735_v45, %v734_v42  ;;  %v732_v52 = vadd.f32 0.5, %v716_v46  ;;  %1166 = vtanh.f32 %v693_v47  ;;  %v634_v53 = vadd.f32 %v633_v49, %v234_v13 }
 0x1c2   :  { %v733_v54 = vadd.f32 0.5, %v717_v48  ;;  %v648_v55 = vadd.f32 %v647_v50, %v235_v14 }
 0x1c3   :  { %v1161_v56 = vpop.eup %1160  ;;  %754 = vst [vmem:[%s1679_s7 + $0x20] sm:$0xff] %v746_v51  ;;  %v690_v57 = vmul.f32 0.5, %v634_v53 }
 0x1c4   :  { %v1163_v58 = vpop.eup %1162  ;;  %v745_v59 = vpack.c.bf16 %v733_v54, %v732_v52  ;;  %v714_v60 = vmul.f32 0.5, %v1161_v56  ;;  %v691_v61 = vmul.f32 0.5, %v648_v55 }
 0x1c5   :  { %v715_v62 = vmul.f32 0.5, %v1163_v58  ;;  %1168 = vtanh.f32 %v690_v57 }
 0x1c6   :  { %v1165_v63 = vpop.eup %1164  ;;  %753 = vst [vmem:[%s1679_s7 + $0x18] sm:$0xff] %v745_v59  ;;  %v730_v0 = vadd.f32 0.5, %v714_v60  ;;  %1170 = vtanh.f32 %v691_v61 }
 0x1c7   :  { %v1167_v1 = vpop.eup %1166  ;;  %v731_v2 = vadd.f32 0.5, %v715_v62  ;;  %v724_v3 = vmul.f32 0.5, %v1165_v63 }
 0x1c8   :  { %v725_v4 = vmul.f32 0.5, %v1167_v1 }
 0x1c9   :  { %v744_v5 = vpack.c.bf16 %v731_v2, %v730_v0  ;;  %v740_v6 = vadd.f32 0.5, %v724_v3 }
 0x1ca   :  { %v741_v7 = vadd.f32 0.5, %v725_v4 }
 0x1cb   :  { %v1169_v8 = vpop.eup %1168  ;;  %752 = vst [vmem:[%s1679_s7 + $0x10] sm:$0xff] %v744_v5 }
 0x1cc   :  { %v1171_v9 = vpop.eup %1170  ;;  %v749_v10 = vpack.c.bf16 %v741_v7, %v740_v6  ;;  %v722_v11 = vmul.f32 0.5, %v1169_v8 }
 0x1cd   :  { %v723_v12 = vmul.f32 0.5, %v1171_v9 }
 0x1ce   :  { %757 = vst [vmem:[%s1679_s7 + $0x38] sm:$0xff] %v749_v10  ;;  %v738_v13 = vadd.f32 0.5, %v722_v11 }
 0x1cf   :  { %v739_v14 = vadd.f32 0.5, %v723_v12 }
 0x1d1   :  { %v748_v15 = vpack.c.bf16 %v739_v14, %v738_v13 }
 0x1d3   :  { %756 = vst [vmem:[%s1679_s7 + $0x30] sm:$0xff] %v748_v15 }

</bundles_post_ra>
